<compile_context>
chip_gen: v6e
topology: v6e:2x2x1
jax: 0.10.0
libtpu: 0.0.40
codegen_flags: <defaults>
</compile_context>

<pallas_src>
import functools

import jax
import jax.numpy as jnp
from jax.experimental import pallas as pl
from jax.experimental.pallas import tpu as pltpu


def _round_up(x, m):
    return (x + m - 1) // m * m


# ----------------------- chip-aware sizing helpers ------------------------- #

def _vmem_capacity_bytes():
    try:
        info = pltpu.get_tpu_info()
        cap = getattr(info, "vmem_capacity_bytes", None)
        if isinstance(cap, int) and cap > 0:
            return cap
    except Exception:
        pass
    return 64 * 1024 * 1024          # conservative: v7x per-TensorCore VMEM


def _num_tensorcores():
    try:
        info = pltpu.get_tpu_info()
        for name in ("num_tensorcores", "num_cores", "core_count",
                     "tensorcores_per_chip", "cores_per_chip"):
            v = getattr(info, name, None)
            if isinstance(v, int) and v > 0:
                return v
    except Exception:
        pass
    return 1


def _vmem_estimate(tile_m, tile_i, F, Hp):
    """Rough VMEM footprint: double-buffered pipeline blocks + scratch."""
    b = 0
    b += 2 * tile_m * F * 2            # x tile (bf16), double-buffered
    b += 2 * F * (2 * tile_i) * 2      # fused W1 tile (bf16)
    b += 2 * (2 * tile_i) * 4          # fused b1 tile (fp32)
    b += 2 * tile_i * Hp * 2           # W2 tile (bf16)
    b += 2 * Hp * 4                    # b2 tile (fp32)
    b += 2 * tile_m * Hp * 2           # output tile (bf16)
    b += tile_m * F * 2                # LN cache scratch (bf16)
    b += tile_m * Hp * 4               # fp32 accumulator scratch
    return b


def _token_tile_candidates(N, n_tc):
    npad8 = _round_up(max(N, 1), 8)
    cap = npad8
    if n_tc > 1 and npad8 >= 256:
        # Keep >= n_tc token tiles so the "parallel" axis shards across cores.
        cap = min(cap, _round_up(-(-npad8 // n_tc), 8))
    cands = {min(c, cap) for c in (1024, 512, 256, 128)}
    if cap < 128:
        cands.add(cap)
    return sorted(cands, reverse=True)


def _select_tiles(N, F, half, Hp, budget, n_tc=1):
    """Prefer the largest token tile (weight streaming bound), then the largest
    intermediate tile that divides `half` and fits the VMEM budget."""
    m_cands = _token_tile_candidates(N, n_tc)
    i_pref = [t for t in (2048, 1024, 512, 256, 128) if half % t == 0]
    if not i_pref:   # robust fallback: largest divisor of half (<= 2048)
        i_pref = [d for d in range(min(half, 2048), 0, -1) if half % d == 0]
    for tm in m_cands:
        for ti in i_pref:
            if _vmem_estimate(tm, ti, F, Hp) <= budget:
                return tm, ti
    return m_cands[-1], i_pref[-1]


# ----------------------------- Pallas kernel ------------------------------- #

def _projector_kernel(x_ref, w1f_ref, b1f_ref, w2_ref, b2_ref, o_ref,
                      xn_ref, acc_ref, *, eps, tile_i):
    # Grid = (token tiles, intermediate-dim tiles); axis 1 is the reduction.
    k = pl.program_id(1)

    @pl.when(k == 0)
    def _init():
        # LayerNorm (gamma/beta already folded into W1/b1) — fp32 on the VPU,
        # done once per token tile and cached bf16 for all k steps.
        x = x_ref[...].astype(jnp.float32)                       # (TM, F)
        mean = jnp.mean(x, axis=-1, keepdims=True)
        var = jnp.mean(jnp.square(x - mean), axis=-1, keepdims=True)
        xn = (x - mean) * jax.lax.rsqrt(var + eps)
        xn_ref[...] = xn.astype(xn_ref.dtype)                    # bf16 cache
        acc_ref[...] = jnp.zeros_like(acc_ref)

    xn = xn_ref[...]                                             # (TM, F) bf16

    # Fused Linear-1: one (F, 2*TI) weight block laid out as [x half | gate
    # half] -> single weight DMA stream + single MXU matmul per grid step.
    h = jnp.dot(xn, w1f_ref[...],
                preferred_element_type=jnp.float32) + b1f_ref[...]   # (TM, 2TI)
    h_x = h[:, :tile_i]
    h_g = h[:, tile_i:]

    # SwiGLU: silu(gate) * x   (fp32 on VPU/EUP).
    hs = (h_g * jax.nn.sigmoid(h_g)) * h_x                       # (TM, TI)

    # Linear-2 partial product over this intermediate tile, accumulated fp32.
    acc_ref[...] += jnp.dot(hs.astype(w2_ref.dtype), w2_ref[...],
                            preferred_element_type=jnp.float32)  # (TM, Hp)

    @pl.when(k == pl.num_programs(1) - 1)
    def _finalize():
        o_ref[...] = (acc_ref[...]
                      + b2_ref[...].astype(jnp.float32)).astype(o_ref.dtype)


def projector_pallas(x_tokens, w1_fused, b1_fused, w2, b2, *, eps, tile_m,
                     tile_i, out_dtype, vmem_limit_bytes):
    """x_tokens: (N, F) bf16; N % tile_m == 0; output lane dim 128-padded."""
    N, F = x_tokens.shape
    half, Hp = w2.shape
    assert N % tile_m == 0, "wrapper must pad token count to tile_m"
    assert half % tile_i == 0, "tile_i must divide the intermediate half-dim"
    assert Hp % 128 == 0, "wrapper must pad output features to 128 lanes"
    assert w1_fused.shape == (F, 2 * half)

    n_m = N // tile_m
    n_k = half // tile_i

    kernel = functools.partial(_projector_kernel, eps=eps, tile_i=tile_i)

    # Advisory cost estimate so XLA schedules surrounding ops around this call.
    flops = 2 * N * F * (2 * half) + 2 * N * half * Hp
    transcendentals = N * half                     # sigmoid in SwiGLU
    bytes_accessed = (
        x_tokens.size * x_tokens.dtype.itemsize
        + N * Hp * jnp.dtype(out_dtype).itemsize
        + n_m * (w1_fused.size * w1_fused.dtype.itemsize
                 + w2.size * w2.dtype.itemsize)
        + b1_fused.size * 4 + b2.size * 4)
    cost = pl.CostEstimate(flops=flops, transcendentals=transcendentals,
                           bytes_accessed=bytes_accessed)

    # TODO(synk): on v7x, single-buffer the x block (pipeline_mode=pl.Buffered(1))
    # since its block index only changes every n_k steps; reclaims ~one tile of VMEM.
    return pl.pallas_call(
        kernel,
        out_shape=jax.ShapeDtypeStruct((N, Hp), out_dtype),
        grid_spec=pltpu.PrefetchScalarGridSpec(
            num_scalar_prefetch=0,
            grid=(n_m, n_k),
            in_specs=[
                pl.BlockSpec((tile_m, F), lambda m, k: (m, 0)),      # tokens
                pl.BlockSpec((F, 2 * tile_i), lambda m, k: (0, k)),  # W1 fused
                pl.BlockSpec((1, 2 * tile_i), lambda m, k: (0, k)),  # b1 fused
                pl.BlockSpec((tile_i, Hp), lambda m, k: (k, 0)),     # W2
                pl.BlockSpec((1, Hp), lambda m, k: (0, 0)),          # b2
            ],
            out_specs=pl.BlockSpec((tile_m, Hp), lambda m, k: (m, 0)),
            scratch_shapes=[
                pltpu.VMEM((tile_m, F), x_tokens.dtype),   # cached LN output
                pltpu.VMEM((tile_m, Hp), jnp.float32),     # Linear-2 accumulator
            ],
        ),
        compiler_params=pltpu.CompilerParams(
            dimension_semantics=("parallel", "arbitrary"),
            vmem_limit_bytes=int(vmem_limit_bytes),
        ),
        cost_estimate=cost,
    )(x_tokens, w1_fused, b1_fused, w2, b2)


# ------------------------------ JAX glue ------------------------------------ #

def pixel_shuffle(image_features, downsample_factor):
    """Exact port of AyaVisionMultiModalProjector.pixel_shuffle (B, S, D)."""
    B, S, D = image_features.shape
    height = width = int(S ** 0.5)
    ds = downsample_factor
    x = image_features.reshape(B, width, height, D)
    x = x.reshape(B, width, height // ds, D * ds)
    x = jnp.transpose(x, (0, 2, 1, 3))
    x = x.reshape(B, height // ds, width // ds, D * ds * ds)
    x = jnp.transpose(x, (0, 2, 1, 3))
    return x  # (B, width//ds, height//ds, D*ds**2)


def aya_vision_projector(image_features, params, *, downsample_factor, eps,
                         compute_dtype=jnp.bfloat16, out_dtype=jnp.bfloat16):
    shuffled = pixel_shuffle(image_features, downsample_factor)
    B, Wd, Hd, F = shuffled.shape
    tokens = shuffled.reshape(B * Wd * Hd, F)
    N = tokens.shape[0]

    w1 = params["w1"].astype(jnp.float32)       # (F, I)     torch W1.T
    b1 = params["b1"].astype(jnp.float32)       # (I,)
    gamma = params["gamma"].astype(jnp.float32)  # (F,)
    beta = params["beta"].astype(jnp.float32)    # (F,)
    w2 = params["w2"].astype(jnp.float32)       # (I//2, H)  torch W2.T
    b2 = params["b2"].astype(jnp.float32)       # (H,)

    inter = w1.shape[1]
    half = inter // 2
    H = w2.shape[1]
    Hp = _round_up(H, 128)                      # lane-dense output

    # --- chip-aware tile / VMEM budget selection ----------------------------
    cap = _vmem_capacity_bytes()
    budget = int(cap * 3 // 4)                  # headroom for compiler scratch
    n_tc = _num_tensorcores()
    tile_m, tile_i = _select_tiles(N, F, half, Hp, budget, n_tc)

    # --- fold LayerNorm affine into Linear-1 ---------------------------------
    # (xn*gamma + beta) @ W1 + b1 == xn @ (gamma[:,None]*W1) + (beta @ W1 + b1)
    w1_eff = gamma[:, None] * w1
    b1_eff = b1 + beta @ w1

    # --- split into (x, gate) halves, interleave per intermediate tile -------
    n_k = half // tile_i
    w1_x = w1_eff[:, :half].reshape(F, n_k, tile_i)
    w1_g = w1_eff[:, half:].reshape(F, n_k, tile_i)
    w1_fused = jnp.stack([w1_x, w1_g], axis=2).reshape(F, 2 * half)
    w1_fused = w1_fused.astype(compute_dtype)

    b1_x = b1_eff[:half].reshape(n_k, tile_i)
    b1_g = b1_eff[half:].reshape(n_k, tile_i)
    b1_fused = jnp.stack([b1_x, b1_g], axis=1).reshape(1, 2 * half)
    b1_fused = b1_fused.astype(jnp.float32)

    # --- lane-dense padded Linear-2 weights ----------------------------------
    w2_p = jnp.zeros((half, Hp), compute_dtype).at[:, :H].set(
        w2.astype(compute_dtype))
    b2_p = jnp.zeros((1, Hp), jnp.float32).at[:, :H].set(b2)

    # --- pad + cast tokens (bf16 halves the x-block DMA and VMEM) ------------
    Np = _round_up(N, tile_m)
    tokens_p = jnp.zeros((Np, F), compute_dtype).at[:N].set(
        tokens.astype(compute_dtype))

    out = projector_pallas(tokens_p, w1_fused, b1_fused, w2_p, b2_p,
                           eps=eps, tile_m=tile_m, tile_i=tile_i,
                           out_dtype=out_dtype, vmem_limit_bytes=budget)
    return out[:N, :H].reshape(B, Wd, Hd, H)


# Pure-JAX fp32 reference for correctness checking.
def _reference(image_features, params, *, downsample_factor, eps):
    x = pixel_shuffle(image_features, downsample_factor)
    mean = jnp.mean(x, axis=-1, keepdims=True)
    var = jnp.mean(jnp.square(x - mean), axis=-1, keepdims=True)
    xn = (x - mean) / jnp.sqrt(var + eps)
    xn = xn * params["gamma"] + params["beta"]
    h = xn @ params["w1"] + params["b1"]
    half = h.shape[-1] // 2
    xh, gate = h[..., :half], h[..., half:]
    hs = (gate * jax.nn.sigmoid(gate)) * xh
    return hs @ params["w2"] + params["b2"]


# ------------------------------- main --------------------------------------- #

if __name__ == "__main__":
    # Synthetic config (small, consistent with the module's forward):
    batch = 2
    seq_len = 16               # height = width = 4
    vision_hidden = 32
    downsample_factor = 2
    in_dim = vision_hidden * downsample_factor ** 2   # 128
    alignment_intermediate = 256                       # SwiGLU split -> 2 x 128
    text_hidden = 64
    eps = 1e-5

    key = jax.random.PRNGKey(0)
    k_x, k_g, k_b, k_w1, k_b1, k_w2, k_b2 = jax.random.split(key, 7)

    image_features = jax.random.normal(
        k_x, (batch, seq_len, vision_hidden), dtype=jnp.float32)

    params = {
        # LayerNorm weight/bias
        "gamma": (1.0 + 0.02 * jax.random.normal(k_g, (in_dim,))
                  ).astype(jnp.float32),
        "beta": (0.02 * jax.random.normal(k_b, (in_dim,))).astype(jnp.float32),
        # Linear1: stored as (in, out) = W.T of torch's (out, in)
        "w1": (0.02 * jax.random.normal(
            k_w1, (in_dim, alignment_intermediate))).astype(jnp.float32),
        "b1": (0.02 * jax.random.normal(
            k_b1, (alignment_intermediate,))).astype(jnp.float32),
        # Linear2: (in, out) = (alignment_intermediate // 2, text_hidden)
        "w2": (0.02 * jax.random.normal(
            k_w2, (alignment_intermediate // 2, text_hidden))
               ).astype(jnp.float32),
        "b2": (0.02 * jax.random.normal(
            k_b2, (text_hidden,))).astype(jnp.float32),
    }

    out = aya_vision_projector(image_features, params,
                               downsample_factor=downsample_factor, eps=eps)
    out = jax.block_until_ready(out)

    ref = _reference(image_features, params,
                     downsample_factor=downsample_factor, eps=eps)
    assert out.shape == ref.shape == (batch, 2, 2, text_hidden), out.shape
    # bf16 MXU operands / bf16 output + fp32 accumulation vs pure-fp32 reference.
    err = float(jnp.max(jnp.abs(out.astype(jnp.float32) - ref)))
    scale = float(jnp.max(jnp.abs(ref))) + 1e-6
    assert err / scale < 5e-2, f"mismatch vs reference: rel={err / scale:.4f}"

    print("KERNEL_OK")
</pallas_src>

<mosaic_0001>
module attributes {stable_mosaic.version = 11 : i64} {
  func.func @_projector_kernel(%arg0: i32, %arg1: i32, %arg2: memref<8x128xbf16, #tpu.memory_space<vmem>>, %arg3: memref<128x256xbf16, #tpu.memory_space<vmem>>, %arg4: memref<1x256xf32, #tpu.memory_space<vmem>>, %arg5: memref<128x128xbf16, #tpu.memory_space<vmem>>, %arg6: memref<1x128xf32, #tpu.memory_space<vmem>>, %arg7: memref<8x128xbf16, #tpu.memory_space<vmem>>, %arg8: memref<8x128xbf16, #tpu.memory_space<vmem>>, %arg9: memref<8x128xf32, #tpu.memory_space<vmem>>) attributes {dimension_semantics = [#tpu.dimension_semantics<parallel>, #tpu.dimension_semantics<arbitrary>], iteration_bounds = array<i64: 1, 1>, scalar_prefetch = 0 : i64, scratch_operands = 2 : i64, tpu.core_type = #tpu.core_type<tc>, window_params = [{transform_indices = @transform_0, window_bounds = array<i64: 8, 128>}, {transform_indices = @transform_1, window_bounds = array<i64: 128, 256>}, {transform_indices = @transform_2, window_bounds = array<i64: 1, 256>}, {transform_indices = @transform_3, window_bounds = array<i64: 128, 128>}, {pipeline_mode = #tpu.pipeline_mode<synchronous>, transform_indices = @transform_4, window_bounds = array<i64: 1, 128>}, {transform_indices = @transform_5, window_bounds = array<i64: 8, 128>}]} {
    %c0_i32 = arith.constant 0 : i32
    %0 = arith.cmpi eq, %arg1, %c0_i32 : i32
    %1 = arith.extui %0 : i1 to i32
    %c0_i32_0 = arith.constant 0 : i32
    %2 = arith.cmpi ne, %1, %c0_i32_0 : i32
    scf.if %2 {
      %c0_16 = arith.constant 0 : index
      %c0_17 = arith.constant 0 : index
      %27 = vector.load %arg2[%c0_16, %c0_17] : memref<8x128xbf16, #tpu.memory_space<vmem>>, vector<8x128xbf16>
      %28 = arith.extf %27 : vector<8x128xbf16> to vector<8x128xf32>
      %cst_18 = arith.constant dense<0.000000e+00> : vector<8xf32>
      %29 = vector.multi_reduction <add>, %28, %cst_18 [1] : vector<8x128xf32> to vector<8xf32>
      %30 = vector.shape_cast %29 : vector<8xf32> to vector<8x1xf32>
      %cst_19 = arith.constant 1.280000e+02 : f32
      %31 = vector.broadcast %cst_19 : f32 to vector<8x1xf32>
      %32 = arith.divf %30, %31 : vector<8x1xf32>
      %33 = vector.broadcast %32 : vector<8x1xf32> to vector<8x128xf32>
      %34 = arith.subf %28, %33 : vector<8x128xf32>
      %35 = arith.mulf %34, %34 : vector<8x128xf32>
      %cst_20 = arith.constant dense<0.000000e+00> : vector<8xf32>
      %36 = vector.multi_reduction <add>, %35, %cst_20 [1] : vector<8x128xf32> to vector<8xf32>
      %37 = vector.shape_cast %36 : vector<8xf32> to vector<8x1xf32>
      %cst_21 = arith.constant 1.280000e+02 : f32
      %38 = vector.broadcast %cst_21 : f32 to vector<8x1xf32>
      %39 = arith.divf %37, %38 : vector<8x1xf32>
      %40 = vector.broadcast %32 : vector<8x1xf32> to vector<8x128xf32>
      %41 = arith.subf %28, %40 : vector<8x128xf32>
      %cst_22 = arith.constant 9.99999974E-6 : f32
      %42 = vector.broadcast %cst_22 : f32 to vector<8x1xf32>
      %43 = arith.addf %39, %42 : vector<8x1xf32>
      %44 = math.rsqrt %43 : vector<8x1xf32>
      %45 = vector.broadcast %44 : vector<8x1xf32> to vector<8x128xf32>
      %46 = arith.mulf %41, %45 : vector<8x128xf32>
      %47 = arith.truncf %46 : vector<8x128xf32> to vector<8x128xbf16>
      %c0_23 = arith.constant 0 : index
      %c0_24 = arith.constant 0 : index
      %48 = vector.load %arg8[%c0_23, %c0_24] : memref<8x128xbf16, #tpu.memory_space<vmem>>, vector<8x128xbf16>
      tpu.vector_store %arg8[%c0_23, %c0_24], %47 {strides = array<i32>} : memref<8x128xbf16, #tpu.memory_space<vmem>>, vector<8x128xbf16>,
      %cst_25 = arith.constant 0.000000e+00 : f32
      %49 = vector.broadcast %cst_25 : f32 to vector<8x128xf32>
      %c0_26 = arith.constant 0 : index
      %c0_27 = arith.constant 0 : index
      %50 = vector.load %arg9[%c0_26, %c0_27] : memref<8x128xf32, #tpu.memory_space<vmem>>, vector<8x128xf32>
      tpu.vector_store %arg9[%c0_26, %c0_27], %49 {strides = array<i32>} : memref<8x128xf32, #tpu.memory_space<vmem>>, vector<8x128xf32>,
    } else {
    }
    %c0 = arith.constant 0 : index
    %c0_1 = arith.constant 0 : index
    %3 = vector.load %arg8[%c0, %c0_1] : memref<8x128xbf16, #tpu.memory_space<vmem>>, vector<8x128xbf16>
    %c0_2 = arith.constant 0 : index
    %c0_3 = arith.constant 0 : index
    %4 = vector.load %arg3[%c0_2, %c0_3] : memref<128x256xbf16, #tpu.memory_space<vmem>>, vector<128x256xbf16>
    %cst = arith.constant dense<0.000000e+00> : vector<8x256xf32>
    %5 = tpu.matmul %3, %4, %cst {dimension_numbers = #tpu.dot_dimension_numbers<[1], [0], [0], [1], [0, 0, 1, 1], [], []>} : vector<8x128xbf16>, vector<128x256xbf16>, vector<8x256xf32> -> vector<8x256xf32>
    %c0_4 = arith.constant 0 : index
    %c0_5 = arith.constant 0 : index
    %6 = vector.load %arg4[%c0_4, %c0_5] : memref<1x256xf32, #tpu.memory_space<vmem>>, vector<1x256xf32>
    %7 = vector.broadcast %6 : vector<1x256xf32> to vector<8x256xf32>
    %8 = arith.addf %5, %7 : vector<8x256xf32>
    %9 = vector.extract_strided_slice %8 {offsets = [0, 0], sizes = [8, 128], strides = [1, 1]} : vector<8x256xf32> to vector<8x128xf32>
    %10 = vector.extract_strided_slice %8 {offsets = [0, 128], sizes = [8, 128], strides = [1, 1]} : vector<8x256xf32> to vector<8x128xf32>
    %11 = arith.negf %10 : vector<8x128xf32>
    %12 = math.exp %11 : vector<8x128xf32>
    %cst_6 = arith.constant 1.000000e+00 : f32
    %13 = vector.broadcast %cst_6 : f32 to vector<8x128xf32>
    %14 = arith.addf %13, %12 : vector<8x128xf32>
    %15 = arith.divf %13, %14 : vector<8x128xf32>
    %16 = arith.mulf %10, %15 : vector<8x128xf32>
    %17 = arith.mulf %16, %9 : vector<8x128xf32>
    %c0_7 = arith.constant 0 : index
    %c0_8 = arith.constant 0 : index
    %18 = vector.load %arg9[%c0_7, %c0_8] : memref<8x128xf32, #tpu.memory_space<vmem>>, vector<8x128xf32>
    %19 = arith.truncf %17 : vector<8x128xf32> to vector<8x128xbf16>
    %c0_9 = arith.constant 0 : index
    %c0_10 = arith.constant 0 : index
    %20 = vector.load %arg5[%c0_9, %c0_10] : memref<128x128xbf16, #tpu.memory_space<vmem>>, vector<128x128xbf16>
    %cst_11 = arith.constant dense<0.000000e+00> : vector<8x128xf32>
    %21 = tpu.matmul %19, %20, %cst_11 {dimension_numbers = #tpu.dot_dimension_numbers<[1], [0], [0], [1], [0, 0, 1, 1], [], []>} : vector<8x128xbf16>, vector<128x128xbf16>, vector<8x128xf32> -> vector<8x128xf32>
    %22 = arith.addf %18, %21 : vector<8x128xf32>
    %c0_12 = arith.constant 0 : index
    %c0_13 = arith.constant 0 : index
    %23 = vector.load %arg9[%c0_12, %c0_13] : memref<8x128xf32, #tpu.memory_space<vmem>>, vector<8x128xf32>
    tpu.vector_store %arg9[%c0_12, %c0_13], %22 {strides = array<i32>} : memref<8x128xf32, #tpu.memory_space<vmem>>, vector<8x128xf32>,
    %c0_i32_14 = arith.constant 0 : i32
    %24 = arith.cmpi eq, %arg1, %c0_i32_14 : i32
    %25 = arith.extui %24 : i1 to i32
    %c0_i32_15 = arith.constant 0 : i32
    %26 = arith.cmpi ne, %25, %c0_i32_15 : i32
    scf.if %26 {
      %c0_16 = arith.constant 0 : index
      %c0_17 = arith.constant 0 : index
      %27 = vector.load %arg9[%c0_16, %c0_17] : memref<8x128xf32, #tpu.memory_space<vmem>>, vector<8x128xf32>
      %c0_18 = arith.constant 0 : index
      %c0_19 = arith.constant 0 : index
      %28 = vector.load %arg6[%c0_18, %c0_19] : memref<1x128xf32, #tpu.memory_space<vmem>>, vector<1x128xf32>
      %29 = vector.broadcast %28 : vector<1x128xf32> to vector<8x128xf32>
      %30 = arith.addf %27, %29 : vector<8x128xf32>
      %31 = arith.truncf %30 : vector<8x128xf32> to vector<8x128xbf16>
      %c0_20 = arith.constant 0 : index
      %c0_21 = arith.constant 0 : index
      %32 = vector.load %arg7[%c0_20, %c0_21] : memref<8x128xbf16, #tpu.memory_space<vmem>>, vector<8x128xbf16>
      tpu.vector_store %arg7[%c0_20, %c0_21], %31 {strides = array<i32>} : memref<8x128xbf16, #tpu.memory_space<vmem>>, vector<8x128xbf16>,
    } else {
    }
    return
  }
  func.func @transform_0(%arg0: i32, %arg1: i32) -> (i32, i32) {
    %c0_i32 = arith.constant 0 : i32
    %c0_i32_0 = arith.constant 0 : i32
    return %arg0, %c0_i32 : i32, i32
  }
  func.func @transform_1(%arg0: i32, %arg1: i32) -> (i32, i32) {
    %c0_i32 = arith.constant 0 : i32
    %c0_i32_0 = arith.constant 0 : i32
    return %c0_i32, %arg1 : i32, i32
  }
  func.func @transform_2(%arg0: i32, %arg1: i32) -> (i32, i32) {
    %c0_i32 = arith.constant 0 : i32
    %c0_i32_0 = arith.constant 0 : i32
    return %c0_i32, %arg1 : i32, i32
  }
  func.func @transform_3(%arg0: i32, %arg1: i32) -> (i32, i32) {
    %c0_i32 = arith.constant 0 : i32
    %c0_i32_0 = arith.constant 0 : i32
    return %arg1, %c0_i32 : i32, i32
  }
  func.func @transform_4(%arg0: i32, %arg1: i32) -> (i32, i32) {
    %c0_i32 = arith.constant 0 : i32
    %c0_i32_0 = arith.constant 0 : i32
    %c0_i32_1 = arith.constant 0 : i32
    return %c0_i32, %c0_i32_0 : i32, i32
  }
  func.func @transform_5(%arg0: i32, %arg1: i32) -> (i32, i32) {
    %c0_i32 = arith.constant 0 : i32
    %c0_i32_0 = arith.constant 0 : i32
    return %arg0, %c0_i32 : i32, i32
  }
}

</mosaic_0001>

<bundles_post_ra>
// kernel: tpu_custom_call.1
= control target key start
LH: loop header
LB: loop body
LE: loop exit
PB: predicated region body
PF: predicated region fallthrough
CT: control target
= control target key end

     0   :  { %10 = vsyncpa [#allocation5], 0  ;;  %s627_s0 = inlined_call_operand.hbm [shape: bf16[8,128], index: 0, kind: input, shape index: {}]   ;;  %s628_s1 = inlined_call_operand.hbm [shape: bf16[128,256], index: 1, kind: input, shape index: {}]   ;;  %s629_s2 = inlined_call_operand.vmem [shape: f32[1,256], index: 2, kind: input, shape index: {}]   ;;  %s630_s3 = inlined_call_operand.hbm [shape: bf16[128,128], index: 3, kind: input, shape index: {}]   ;;  %s631_s4 = inlined_call_operand.vmem [shape: f32[1,128], index: 4, kind: input, shape index: {}]   ;;  %s632_s5 = inlined_call_operand.hbm [shape: bf16[8,128], index: 5, kind: output, shape index: {}]  }
   0x1   :  { %11 = vsyncpa [#allocation8], 0 }
   0x2   :  { %12 = vsyncpa [#allocation6], 0  ;;  %s568_s18 = smov [#allocation7]  }
   0x3   :  { %s28_s19 = sshll.u32 %s568_s18, 4  ;;  %s29_s19 = int_to_ptr.vmem [resolvable:$true] %s28_s19 }
   0x4   :  { %s490_s20 = scalar_lea.vmem %s29_s19, 2048  ;;  %p495_p1 = scmp.lt.s32.totalorder %s29_s19, %s29_s19 }
   0x5   :  { %p491_p0 = scmp.ne.s32.totalorder %s29_s19, %s490_s20  ;;  %p496_p2 = scmp.lt.s32.totalorder %s490_s20, %s490_s20 }
   0x7   :  { %p497_p3 = por %p496_p2, %p495_p1 }
   0x9   :  { %p498_p4 = pnand %p497_p3, %p491_p0 }
   0xb   :  { %501 = shalt.err (!%p498_p4)
}
   0xc   :  { %s569_s21 = smov 128   ;;  %s570_s22 = smov 8  }
   0xd   :  { %34 = dma.hbm_to_vmem [thread:$0]  %s628_s1, 2048, %s29_s19, [#allocation8], %s569_s21, %s569_s21, %s570_s22  }
   0xe   :  { %s571_s25 = smov [#allocation4]   ;;  %s572_s27 = smov [#allocation9]  }
   0xf   :  { %s19_s26 = sshll.u32 %s571_s25, 4  ;;  %s42_s28 = sshll.u32 %s572_s27, 4  ;;  %s20_s26 = int_to_ptr.vmem [resolvable:$true] %s19_s26  ;;  %s43_s28 = int_to_ptr.vmem [resolvable:$true] %s42_s28 }
  0x10   :  { %s510_s29 = scalar_lea.vmem %s20_s26, 64  ;;  %p515_p6 = scmp.lt.s32.totalorder %s20_s26, %s20_s26 }
  0x11   :  { %p511_p5 = scmp.ne.s32.totalorder %s20_s26, %s510_s29  ;;  %p516_p7 = scmp.lt.s32.totalorder %s510_s29, %s510_s29 }
  0x13   :  { %p517_p8 = por %p516_p7, %p515_p6 }
  0x15   :  { %p518_p9 = pnand %p517_p8, %p511_p5 }
  0x17   :  { %521 = shalt.err (!%p518_p9)
}
  0x18   :  { %22 = dma.hbm_to_vmem [thread:$0]  %s627_s0, 64, %s20_s26, [#allocation5]  }
  0x19   :  { %s530_s7 = scalar_lea.vmem %s43_s28, 1024  ;;  %p535_p11 = scmp.lt.s32.totalorder %s43_s28, %s43_s28 }
  0x1a   :  { %p531_p10 = scmp.ne.s32.totalorder %s43_s28, %s530_s7  ;;  %p536_p12 = scmp.lt.s32.totalorder %s530_s7, %s530_s7 }
  0x1c   :  { %p537_p13 = por %p536_p12, %p535_p11 }
  0x1e   :  { %p538_p0 = pnand %p537_p13, %p531_p10 }
  0x20   :  { %541 = shalt.err (!%p538_p0)
}
  0x21   :  { %s573_s1 = smov 64   ;;  %s574_s8 = smov 4  }
  0x22   :  { %48 = dma.hbm_to_vmem [thread:$0]  %s630_s3, 1024, %s43_s28, [#allocation8], %s573_s1, %s573_s1, %s574_s8  }
  0x23   :  { %562 = dma.done.wait [#allocation5], 64  }
  0x24   :  { %563 = vsyncadd [#allocation5], 4294967232 }
  0x25   :  { %564 = dma.done.wait [#allocation8], 3072  }
  0x26   :  { %565 = vsyncadd [#allocation8], 4294964224  ;;  %v65_v0 = vld [vmem:[#allocation4] sm:$0xf]  ;;  %v446_v3 = vld [vmem:[#allocation7 + $0x70] ss:$8 sps:$4 sm:$0xff]   ;;  %v101_v39 = vlaneseq }
  0x27   :  { %v66_v1 = vunpack.c.l.bf16 %v65_v0  ;;  %v444_v2 = vld [vmem:[#allocation7 + $0x74] ss:$8 sps:$4 sm:$0xff]   ;;  %v447_v8 = vld [vmem:[#allocation7 + $0x64] ss:$8 sps:$4 sm:$0xff]   ;;  %v449_v9 = vld [vmem:[#allocation7 + $0x60] ss:$8 sps:$4 sm:$0xff]  }
  0x28   :  { %191 = vmatprep.subr.bf16.mxu0 %v444_v2  ;;  %v450_v10 = vld [vmem:[#allocation7 + $0x54] ss:$8 sps:$4 sm:$0xff]   ;;  %v452_v11 = vld [vmem:[#allocation7 + $0x50] ss:$8 sps:$4 sm:$0xff]   ;;  %v453_v12 = vld [vmem:[#allocation7 + $0x44] ss:$8 sps:$4 sm:$0xff]  }
  0x29   :  { %67 = vadd.xlane.f32.xlu0 %v66_v1  ;;  %192 = vmatpush1.bf16.msra.mxu0 %v446_v3  ;;  %v455_v13 = vld [vmem:[#allocation7 + $0x40] ss:$8 sps:$4 sm:$0xff]   ;;  %v456_v14 = vld [vmem:[#allocation7 + $0x34] ss:$8 sps:$4 sm:$0xff]   ;;  %v458_v15 = vld [vmem:[#allocation7 + $0x30] ss:$8 sps:$4 sm:$0xff]  }
  0x2a   :  { %193 = vmatprep.subr.bf16.mxu0 %v447_v8  ;;  %v459_v16 = vld [vmem:[#allocation7 + $0x24] ss:$8 sps:$4 sm:$0xff]   ;;  %v461_v17 = vld [vmem:[#allocation7 + $0x20] ss:$8 sps:$4 sm:$0xff]   ;;  %v462_v18 = vld [vmem:[#allocation7 + $0x14] ss:$8 sps:$4 sm:$0xff]  }
  0x2b   :  { %v464_v19 = vld [vmem:[#allocation7 + $0x10] ss:$8 sps:$4 sm:$0xff]   ;;  %v465_v20 = vld [vmem:[#allocation7 + $0x4] ss:$8 sps:$4 sm:$0xff]   ;;  %v467_v21 = vld [vmem:[#allocation7] ss:$8 sps:$4 sm:$0xff]  }
  0x2c   :  { %v575_v22 = vmov 0   ;;  %v468_v30 = vld [vmem:[#allocation9 + $0x38] sm:$0xff]   ;;  %v576_v31 = vmov 0.0   ;;  %v469_v32 = vld [vmem:[#allocation9 + $0x30] sm:$0xff]   ;;  %v470_v33 = vld [vmem:[#allocation9 + $0x28] sm:$0xff]   ;;  %vm577_vm0 = vmmov 0  }
  0x2d   :  { %194 = vmatpush1.bf16.msra.mxu0 %v449_v9  ;;  %223 = vmatprep.mubr.bf16.mxu0 %v575_v22  ;;  %v471_v34 = vld [vmem:[#allocation9 + $0x20] sm:$0xff]   ;;  %v472_v35 = vld [vmem:[#allocation9 + $0x18] sm:$0xff]   ;;  %v473_v36 = vld [vmem:[#allocation9 + $0x10] sm:$0xff]   ;;  %v102_v40 = vshrl.u32 %v101_v39, 7  ;;  %s578_s12 = smov [#allocation10]  }
  0x2e   :  { %195 = vmatprep.subr.bf16.mxu0 %v450_v10  ;;  %413 = vmatprep.subr.bf16.mxu1 %v576_v31  ;;  %v474_v37 = vld [vmem:[#allocation9 + $0x8] sm:$0xff]   ;;  %v475_v38 = vld [vmem:[#allocation9] sm:$0xff]   ;;  %v99_v42 = vld [vmem:[%s629_s2] sm:$0x3]  ;;  %s368_s13 = sshll.u32 %s578_s12, 4  ;;  %s369_s13 = int_to_ptr.vmem [resolvable:$true] %s368_s13 }
  0x2f   :  { %414 = vmatpush3.bf16.msra.mxu1 %v468_v30  ;;  %429 = vmatprep.mubr.msk.bf16.mxu1 %vm577_vm0, %v576_v31  ;;  %v107_v41 = vsub.s32 1, %v102_v40  ;;  %v103_v52 = vsub.s32 0, %v102_v40  ;;  %v403_v59 = vld [vmem:[%s631_s4] ss:$0 sm:$0xff]  ;;  %s542_s14 = scalar_lea.vmem %s369_s13, 64  ;;  %p547_p2 = scmp.lt.s32.totalorder %s369_s13, %s369_s13 }
  0x30   :  { %415 = vmatprep.subr.bf16.mxu1 %v576_v31  ;;  %p543_p1 = scmp.ne.s32.totalorder %s369_s13, %s542_s14  ;;  %p548_p3 = scmp.lt.s32.totalorder %s542_s14, %s542_s14 }
  0x31   :  { %196 = vmatpush1.bf16.msra.mxu0 %v452_v11  ;;  %v108_v43 = vrot.slane %v99_v42, %v107_v41  ;;  %v104_v53 = vrot.slane %v99_v42, %v103_v52 }
  0x32   :  { %197 = vmatprep.subr.bf16.mxu0 %v453_v12  ;;  %p549_p4 = por %p548_p3, %p547_p2 }
  0x33   :  { %416 = vmatpush3.bf16.msra.mxu1 %v469_v32 }
  0x34   :  { %417 = vmatprep.subr.bf16.mxu1 %v576_v31  ;;  %p550_p5 = pnand %p549_p4, %p543_p1 }
  0x35   :  { %198 = vmatpush1.bf16.msra.mxu0 %v455_v13 }
  0x36   :  { %199 = vmatprep.subr.bf16.mxu0 %v456_v14 }
  0x37   :  { %418 = vmatpush3.bf16.msra.mxu1 %v470_v33 }
  0x38   :  { %419 = vmatprep.subr.bf16.mxu1 %v576_v31 }
  0x39   :  { %200 = vmatpush1.bf16.msra.mxu0 %v458_v15 }
  0x3a   :  { %201 = vmatprep.subr.bf16.mxu0 %v459_v16 }
  0x3b   :  { %420 = vmatpush3.bf16.msra.mxu1 %v471_v34 }
  0x3c   :  { %421 = vmatprep.subr.bf16.mxu1 %v576_v31 }
  0x3d   :  { %202 = vmatpush1.bf16.msra.mxu0 %v461_v17 }
  0x3e   :  { %203 = vmatprep.subr.bf16.mxu0 %v462_v18 }
  0x3f   :  { %422 = vmatpush3.bf16.msra.mxu1 %v472_v35 }
  0x40   :  { %423 = vmatprep.subr.bf16.mxu1 %v576_v31 }
  0x41   :  { %204 = vmatpush1.bf16.msra.mxu0 %v464_v19 }
  0x42   :  { %205 = vmatprep.subr.bf16.mxu0 %v465_v20 }
  0x43   :  { %424 = vmatpush3.bf16.msra.mxu1 %v473_v36 }
  0x44   :  { %425 = vmatprep.subr.bf16.mxu1 %v576_v31 }
  0x45   :  { %206 = vmatpush1.bf16.msra.mxu0 %v467_v21 }
  0x47   :  { %426 = vmatpush3.bf16.msra.mxu1 %v474_v37 }
  0x48   :  { %427 = vmatprep.subr.bf16.mxu1 %v576_v31 }
  0x4b   :  { %428 = vmatpush3.bf16.msra.mxu1 %v475_v38 }
  0xb2   :  { %v68_v4 = vpop.xlane.xlu0 %67 }
  0xb3   :  { %v70_v5 = vmul.f32 0.0078125, %v68_v4 }
  0xb5   :  { %v71_v6 = vsub.f32 %v66_v1, %v70_v5 }
  0xb7   :  { %v72_v7 = vmul.f32 %v71_v6, %v71_v6 }
  0xb9   :  { %73 = vadd.xlane.f32.xlu0 %v72_v7 }
 0x142   :  { %v74_v23 = vpop.xlane.xlu0 %73 }
 0x143   :  { %v75_v24 = vmul.f32 0.0078125, %v74_v23 }
 0x145   :  { %v76_v25 = vadd.f32 1e-05, %v75_v24 }
 0x147   :  { %476 = vrsqrt.f32 %v76_v25 }
 0x154   :  { %v477_v26 = vpop.eup %476 }
 0x155   :  { %v78_v27 = vmul.f32 %v477_v26, %v71_v6 }
 0x157   :  { %v79_v28 = vpack.c.bf16 %v78_v27, %v78_v27 }
 0x159   :  { %80 = vst [vmem:[#allocation2] sm:$0xf] %v79_v28 }
 0x160   :  { %v82_v29 = vld [vmem:[#allocation2] sm:$0xf] }
 0x161   :  { %224 = vmatmul.mubr.bf16.vlgmr.msra.gmra.mxu0 %v82_v29 }
 0x221   :  { %v225_v44 = vpop.f32.mrf.mxu0 }
 0x222   :  { %v226_v55 = vadd.f32 %v225_v44, %v104_v53 }
 0x223   :  { %v227_v45 = vpop.f32.mrf.mxu0 }
 0x224   :  { %v228_v46 = vadd.f32 %v227_v45, %v108_v43 }
 0x225   :  { %v229_v47 = vpop.f32.mrf.mxu0 }
 0x226   :  { %v394_v48 = vmul.f32 -1.442695, %v228_v46 }
 0x227   :  { %v230_v49 = vpop.f32.mrf.mxu0 }
 0x228   :  { %478 = vpow2.f32 %v394_v48 }
 0x235   :  { %v479_v50 = vpop.eup %478 }
 0x236   :  { %v235_v51 = vadd.f32 1.0, %v479_v50 }
 0x238   :  { %480 = vrcp.f32 %v235_v51 }
 0x245   :  { %v481_v54 = vpop.eup %480 }
 0x246   :  { %v238_v56 = vmul.f32 %v481_v54, %v228_v46 }
 0x248   :  { %v239_v57 = vmul.f32 %v238_v56, %v226_v55 }
 0x24a   :  { %v241_v58 = vpack.c.bf16 %v239_v57, %v239_v57 }
 0x24c   :  { %430 = vmatmul.mubr.bf16.vlgmr.msra.gmra.mxu1 %v241_v58 }
 0x30c   :  { %v340_v60 = vpop.f32.mrf.mxu1 }
 0x30d   :  { %v359_v61 = vadd.f32 %v403_v59, %v340_v60 }
 0x30e   :  { %v431_v62 = vpop.f32.mrf.mxu1 }
 0x30f   :  { %v360_v63 = vpack.c.bf16 %v359_v61, %v359_v61 }
 0x310   :  { %v343_v0 = vpop.f32.mrf.mxu1 }
 0x311   :  { %361 = vst [vmem:[#allocation10] sm:$0xf] %v360_v63 }
 0x312   :  { %v432_v1 = vpop.f32.mrf.mxu1 }
 0x313   :  { %553 = shalt.err (!%p550_p5)
}
 0x314   :  { %371 = dma.vmem_to_hbm [thread:$0]  %s369_s13, 64, %s632_s5, [#allocation6]  }
 0x315   :  { %566 = dma.done.wait [#allocation6], 64  }
 0x316   :  { %567 = vsyncadd [#allocation6], 4294967232 }
 0x317   :  { %375 = vsyncpa [#allocation5], 1 }
 0x318   :  { %376 = vsyncpa [#allocation8], 1 }
 0x319   :  { %377 = vsyncpa [#allocation6], 1 }

</bundles_post_ra>
